<compile_context>
chip_gen: v7x
topology: tpu7x:2x2x1
jax: 0.10.0
libtpu: 0.0.40
codegen_flags: <defaults>
</compile_context>

<pallas_src>
import functools

import jax
import jax.numpy as jnp
from jax.experimental import pallas as pl
from jax.experimental.pallas import tpu as pltpu


_NEG_FILL = -1e30  # large negative, finite (exp underflows to 0; avoids inf-inf -> nan)


def _round_up(x, m):
    return (x + m - 1) // m * m


def _cdiv(a, b):
    return (a + b - 1) // b


def _distill_kernel(ys_ref, yt_ref, out_ref,
                    m_s_ref, m_t_ref, z_s_ref, z_t_ref, acc_ref,
                    *, inv_t, mode, n_rows, n_cols, tb, tc,
                    mask_rows, mask_cols):
    i = pl.program_id(0)          # batch tile (parallel)
    j = pl.program_id(1)          # class tile (reduction, arbitrary)
    nc = pl.num_programs(1)

    # ---- init running accumulators at the start of each row-tile's class loop ----
    @pl.when(j == 0)
    def _():
        m_s_ref[...] = jnp.full(m_s_ref.shape, _NEG_FILL, dtype=jnp.float32)
        m_t_ref[...] = jnp.full(m_t_ref.shape, _NEG_FILL, dtype=jnp.float32)
        z_s_ref[...] = jnp.zeros_like(z_s_ref)
        z_t_ref[...] = jnp.zeros_like(z_t_ref)
        acc_ref[...] = jnp.zeros_like(acc_ref)

    # temperature scaling via precomputed reciprocal (no full-tile divide)
    s = ys_ref[...].astype(jnp.float32) * inv_t
    t = yt_ref[...].astype(jnp.float32) * inv_t

    if mask_cols:
        # Only the last class tile can contain out-of-range (garbage) columns; gate the
        # per-element masking behind a scalar branch so all other tiles pay nothing.
        def _mask(ops):
            s_in, t_in = ops
            col = j * tc + jax.lax.broadcasted_iota(jnp.int32, (1, tc), 1)
            valid = col < n_cols
            return (jnp.where(valid, s_in, _NEG_FILL),
                    jnp.where(valid, t_in, _NEG_FILL))

        s, t = jax.lax.cond(j == nc - 1, _mask, lambda ops: ops, (s, t))

    # ---- online (streaming) softmax statistics over the class axis ----
    m_s_new = jnp.maximum(m_s_ref[...], jnp.max(s, axis=1, keepdims=True))
    m_t_new = jnp.maximum(m_t_ref[...], jnp.max(t, axis=1, keepdims=True))
    a_s = jnp.exp(m_s_ref[...] - m_s_new)
    a_t = jnp.exp(m_t_ref[...] - m_t_new)

    e_s = jnp.exp(s - m_s_new)
    e_t = jnp.exp(t - m_t_new)

    z_s_ref[...] = a_s * z_s_ref[...] + jnp.sum(e_s, axis=1, keepdims=True)
    z_t_ref[...] = a_t * z_t_ref[...] + jnp.sum(e_t, axis=1, keepdims=True)

    if mode == 'ce':
        w = e_t * s                 # -> sum_c e_t * s
    else:  # 'kl'
        w = e_t * (t - s)           # -> sum_c e_t * (t - s)
    acc_ref[...] = a_t * acc_ref[...] + jnp.sum(w, axis=1, keepdims=True)

    m_s_ref[...] = m_s_new
    m_t_ref[...] = m_t_new

    # ---- epilogue: finalize per-row contributions on the last class tile ----
    @pl.when(j == nc - 1)
    def _():
        inv_zt = pl.reciprocal(z_t_ref[...], approx=False)
        log_zs = jnp.log(z_s_ref[...])
        if mode == 'ce':
            # -(sum_c p_t * logp_s) = m_s + log z_s - (sum_c e_t * s)/z_t
            per_row = m_s_ref[...] + log_zs - acc_ref[...] * inv_zt
        else:
            # sum_c p_t * (logp_t - logp_s)
            log_zt = jnp.log(z_t_ref[...])
            per_row = (acc_ref[...] * inv_zt
                       + (m_s_ref[...] - m_t_ref[...])
                       + (log_zs - log_zt))
        if mask_rows:
            # rows past B (ragged last batch tile) carry garbage -> force exactly 0
            row = i * tb + jax.lax.broadcasted_iota(jnp.int32, (tb, 1), 0)
            per_row = jnp.where(row < n_rows, per_row, 0.0)
        out_ref[...] = per_row


def distillation_loss(y_s, y_t, T, mode='ce', *,
                      tb_max=256, tc_max=2048,
                      input_vmem_budget=16 * 1024 * 1024):
    """y_s, y_t: (B, C) logits (f32 or bf16; bf16 halves HBM traffic). Scalar f32 loss.

    T must be a static Python scalar (it is folded into the kernel as 1/T).
    """
    if mode not in ('ce', 'kl'):
        raise ValueError(f'Invalid mode {mode}, mode can only in [`ce`, `kl`]')
    B, C = y_s.shape
    assert y_t.shape == (B, C)
    itemsize = jnp.dtype(y_s.dtype).itemsize

    tc_max = max(128, (tc_max // 128) * 128)
    tb_max = max(8, (tb_max // 8) * 8)

    # ---- class (lane) tiling: full C if it fits (no raggedness), else 128-aligned tc ----
    tc = C if C <= tc_max else tc_max
    nc = _cdiv(C, tc)
    mask_cols = (C % tc) != 0           # only possible when nc >= 2

    # ---- batch (sublane) tiling from a VMEM budget that includes f32 temporaries ----
    # double-buffered inputs (2 arrays * 2 buffers) + ~4 f32 (tb, tc) temporaries
    bytes_per_row = 2 * 2 * tc * itemsize + 4 * tc * 4
    tb_budget = max(8, (input_vmem_budget // bytes_per_row) // 8 * 8)
    if B <= 8:
        tb = B                          # single full-dim block
    else:
        # guarantee >= 2 batch tiles so the "parallel" axis can use both v7x cores
        split_cap = _round_up(_cdiv(B, 2), 8)
        tb = max(8, min(tb_max, tb_budget, split_cap))
    nb = _cdiv(B, tb)
    mask_rows = (B % tb) != 0

    kernel = functools.partial(
        _distill_kernel,
        inv_t=1.0 / float(T), mode=mode,
        n_rows=B, n_cols=C, tb=tb, tc=tc,
        mask_rows=mask_rows, mask_cols=mask_cols)

    per_row = pl.pallas_call(
        kernel,
        out_shape=jax.ShapeDtypeStruct((nb * tb, 1), jnp.float32),
        grid_spec=pltpu.PrefetchScalarGridSpec(
            num_scalar_prefetch=0,
            grid=(nb, nc),
            in_specs=[
                pl.BlockSpec((tb, tc), lambda i, j: (i, j)),
                pl.BlockSpec((tb, tc), lambda i, j: (i, j)),
            ],
            out_specs=pl.BlockSpec((tb, 1), lambda i, j: (i, 0)),
            scratch_shapes=[
                pltpu.VMEM((tb, 1), jnp.float32),   # running max (student)
                pltpu.VMEM((tb, 1), jnp.float32),   # running max (teacher)
                pltpu.VMEM((tb, 1), jnp.float32),   # running Z (student)
                pltpu.VMEM((tb, 1), jnp.float32),   # running Z (teacher)
                pltpu.VMEM((tb, 1), jnp.float32),   # running weighted sum
            ],
        ),
        compiler_params=pltpu.CompilerParams(
            dimension_semantics=("parallel", "arbitrary"),
            vmem_limit_bytes=32 * 1024 * 1024,
        ),
    )(y_s, y_t)

    total = jnp.sum(per_row)
    if mode == 'ce':
        return total / B
    return total * (float(T) ** 2) / B


def _reference(y_s, y_t, T, mode):
    s = y_s.astype(jnp.float32) / T
    t = y_t.astype(jnp.float32) / T
    logp_s = jax.nn.log_softmax(s, axis=1)
    p_t = jax.nn.softmax(t, axis=1)
    if mode == 'ce':
        return -(p_t * logp_s).sum(1).mean()
    logp_t = jax.nn.log_softmax(t, axis=1)
    return jnp.sum(p_t * (logp_t - logp_s)) * T ** 2 / y_s.shape[0]


if __name__ == "__main__":
    key = jax.random.PRNGKey(0)
    T = 4.0
    ok = True

    # (B, C, dtype, tc_max)
    #  - (16, 128, f32)          : clean tiling, single class tile, two batch tiles
    #  - (10, 300, f32)          : ragged batch tile (row mask), tc == C (no column mask)
    #  - (24, 300, f32, tc=128)  : multi class tile + ragged last class tile (lax.cond mask)
    #  - (8, 16, f32)            : tiny single-tile case (B <= 8 path)
    #  - (16, 1000, bf16, tc=256): bf16 inputs (HBM lever) + ragged class tiles
    test_cases = [
        (16, 128, jnp.float32, 2048),
        (10, 300, jnp.float32, 2048),
        (24, 300, jnp.float32, 128),
        (8, 16, jnp.float32, 2048),
        (16, 1000, jnp.bfloat16, 256),
    ]

    for idx, (B, C, dtype, tc_max) in enumerate(test_cases):
        k1, k2 = jax.random.split(jax.random.fold_in(key, idx))
        y_s = jax.random.normal(k1, (B, C), dtype=jnp.float32).astype(dtype)
        y_t = jax.random.normal(k2, (B, C), dtype=jnp.float32).astype(dtype)
        for mode in ('ce', 'kl'):
            loss = distillation_loss(y_s, y_t, T, mode=mode, tc_max=tc_max)
            loss = jax.block_until_ready(loss)
            ref = _reference(y_s, y_t, T, mode)
            if not jnp.allclose(loss, ref, rtol=1e-4, atol=2e-5):
                ok = False
                print(f"MISMATCH B={B} C={C} dtype={dtype} tc_max={tc_max} mode={mode}: "
                      f"kernel={loss} ref={ref}")

    if ok:
        print("KERNEL_OK")
</pallas_src>

<mosaic_0001>
module attributes {stable_mosaic.version = 11 : i64} {
  func.func @_distill_kernel(%arg0: i32, %arg1: i32, %arg2: memref<8x128xf32, #tpu.memory_space<vmem>>, %arg3: memref<8x128xf32, #tpu.memory_space<vmem>>, %arg4: memref<8x1xf32, #tpu.memory_space<vmem>>, %arg5: memref<8x1xf32, #tpu.memory_space<vmem>>, %arg6: memref<8x1xf32, #tpu.memory_space<vmem>>, %arg7: memref<8x1xf32, #tpu.memory_space<vmem>>, %arg8: memref<8x1xf32, #tpu.memory_space<vmem>>, %arg9: memref<8x1xf32, #tpu.memory_space<vmem>>) attributes {dimension_semantics = [#tpu.dimension_semantics<parallel>, #tpu.dimension_semantics<arbitrary>], iteration_bounds = array<i64: 2, 1>, scalar_prefetch = 0 : i64, scratch_operands = 5 : i64, tpu.core_type = #tpu.core_type<tc>, window_params = [{transform_indices = @transform_0, window_bounds = array<i64: 8, 128>}, {transform_indices = @transform_1, window_bounds = array<i64: 8, 128>}, {transform_indices = @transform_2, window_bounds = array<i64: 8, 1>}]} {
    %c0_i32 = arith.constant 0 : i32
    %0 = arith.cmpi eq, %arg1, %c0_i32 : i32
    %1 = arith.extui %0 : i1 to i32
    %c0_i32_0 = arith.constant 0 : i32
    %2 = arith.cmpi ne, %1, %c0_i32_0 : i32
    scf.if %2 {
      %cst_36 = arith.constant -1.000000e+30 : f32
      %53 = vector.broadcast %cst_36 : f32 to vector<8x1xf32>
      %c0_37 = arith.constant 0 : index
      %c0_38 = arith.constant 0 : index
      %54 = vector.load %arg5[%c0_37, %c0_38] : memref<8x1xf32, #tpu.memory_space<vmem>>, vector<8x1xf32>
      tpu.vector_store %arg5[%c0_37, %c0_38], %53 {strides = array<i32>} : memref<8x1xf32, #tpu.memory_space<vmem>>, vector<8x1xf32>,
      %cst_39 = arith.constant -1.000000e+30 : f32
      %55 = vector.broadcast %cst_39 : f32 to vector<8x1xf32>
      %c0_40 = arith.constant 0 : index
      %c0_41 = arith.constant 0 : index
      %56 = vector.load %arg6[%c0_40, %c0_41] : memref<8x1xf32, #tpu.memory_space<vmem>>, vector<8x1xf32>
      tpu.vector_store %arg6[%c0_40, %c0_41], %55 {strides = array<i32>} : memref<8x1xf32, #tpu.memory_space<vmem>>, vector<8x1xf32>,
      %cst_42 = arith.constant 0.000000e+00 : f32
      %57 = vector.broadcast %cst_42 : f32 to vector<8x1xf32>
      %c0_43 = arith.constant 0 : index
      %c0_44 = arith.constant 0 : index
      %58 = vector.load %arg7[%c0_43, %c0_44] : memref<8x1xf32, #tpu.memory_space<vmem>>, vector<8x1xf32>
      tpu.vector_store %arg7[%c0_43, %c0_44], %57 {strides = array<i32>} : memref<8x1xf32, #tpu.memory_space<vmem>>, vector<8x1xf32>,
      %cst_45 = arith.constant 0.000000e+00 : f32
      %59 = vector.broadcast %cst_45 : f32 to vector<8x1xf32>
      %c0_46 = arith.constant 0 : index
      %c0_47 = arith.constant 0 : index
      %60 = vector.load %arg8[%c0_46, %c0_47] : memref<8x1xf32, #tpu.memory_space<vmem>>, vector<8x1xf32>
      tpu.vector_store %arg8[%c0_46, %c0_47], %59 {strides = array<i32>} : memref<8x1xf32, #tpu.memory_space<vmem>>, vector<8x1xf32>,
      %cst_48 = arith.constant 0.000000e+00 : f32
      %61 = vector.broadcast %cst_48 : f32 to vector<8x1xf32>
      %c0_49 = arith.constant 0 : index
      %c0_50 = arith.constant 0 : index
      %62 = vector.load %arg9[%c0_49, %c0_50] : memref<8x1xf32, #tpu.memory_space<vmem>>, vector<8x1xf32>
      tpu.vector_store %arg9[%c0_49, %c0_50], %61 {strides = array<i32>} : memref<8x1xf32, #tpu.memory_space<vmem>>, vector<8x1xf32>,
    } else {
    }
    %c0 = arith.constant 0 : index
    %c0_1 = arith.constant 0 : index
    %3 = vector.load %arg2[%c0, %c0_1] : memref<8x128xf32, #tpu.memory_space<vmem>>, vector<8x128xf32>
    %cst = arith.constant 2.500000e-01 : f32
    %4 = vector.broadcast %cst : f32 to vector<8x128xf32>
    %5 = arith.mulf %3, %4 : vector<8x128xf32>
    %c0_2 = arith.constant 0 : index
    %c0_3 = arith.constant 0 : index
    %6 = vector.load %arg3[%c0_2, %c0_3] : memref<8x128xf32, #tpu.memory_space<vmem>>, vector<8x128xf32>
    %cst_4 = arith.constant 2.500000e-01 : f32
    %7 = vector.broadcast %cst_4 : f32 to vector<8x128xf32>
    %8 = arith.mulf %6, %7 : vector<8x128xf32>
    %c0_5 = arith.constant 0 : index
    %c0_6 = arith.constant 0 : index
    %9 = vector.load %arg5[%c0_5, %c0_6] : memref<8x1xf32, #tpu.memory_space<vmem>>, vector<8x1xf32>
    %cst_7 = arith.constant dense<0xFF800000> : vector<8xf32>
    %10 = vector.multi_reduction <maximumf>, %5, %cst_7 [1] : vector<8x128xf32> to vector<8xf32>
    %11 = vector.shape_cast %10 : vector<8xf32> to vector<8x1xf32>
    %12 = arith.maximumf %9, %11 : vector<8x1xf32>
    %c0_8 = arith.constant 0 : index
    %c0_9 = arith.constant 0 : index
    %13 = vector.load %arg6[%c0_8, %c0_9] : memref<8x1xf32, #tpu.memory_space<vmem>>, vector<8x1xf32>
    %cst_10 = arith.constant dense<0xFF800000> : vector<8xf32>
    %14 = vector.multi_reduction <maximumf>, %8, %cst_10 [1] : vector<8x128xf32> to vector<8xf32>
    %15 = vector.shape_cast %14 : vector<8xf32> to vector<8x1xf32>
    %16 = arith.maximumf %13, %15 : vector<8x1xf32>
    %c0_11 = arith.constant 0 : index
    %c0_12 = arith.constant 0 : index
    %17 = vector.load %arg5[%c0_11, %c0_12] : memref<8x1xf32, #tpu.memory_space<vmem>>, vector<8x1xf32>
    %18 = arith.subf %17, %12 : vector<8x1xf32>
    %19 = math.exp %18 : vector<8x1xf32>
    %c0_13 = arith.constant 0 : index
    %c0_14 = arith.constant 0 : index
    %20 = vector.load %arg6[%c0_13, %c0_14] : memref<8x1xf32, #tpu.memory_space<vmem>>, vector<8x1xf32>
    %21 = arith.subf %20, %16 : vector<8x1xf32>
    %22 = math.exp %21 : vector<8x1xf32>
    %23 = vector.broadcast %12 : vector<8x1xf32> to vector<8x128xf32>
    %24 = arith.subf %5, %23 : vector<8x128xf32>
    %25 = math.exp %24 : vector<8x128xf32>
    %26 = vector.broadcast %16 : vector<8x1xf32> to vector<8x128xf32>
    %27 = arith.subf %8, %26 : vector<8x128xf32>
    %28 = math.exp %27 : vector<8x128xf32>
    %c0_15 = arith.constant 0 : index
    %c0_16 = arith.constant 0 : index
    %29 = vector.load %arg7[%c0_15, %c0_16] : memref<8x1xf32, #tpu.memory_space<vmem>>, vector<8x1xf32>
    %30 = arith.mulf %19, %29 : vector<8x1xf32>
    %cst_17 = arith.constant dense<0.000000e+00> : vector<8xf32>
    %31 = vector.multi_reduction <add>, %25, %cst_17 [1] : vector<8x128xf32> to vector<8xf32>
    %32 = vector.shape_cast %31 : vector<8xf32> to vector<8x1xf32>
    %33 = arith.addf %30, %32 : vector<8x1xf32>
    %c0_18 = arith.constant 0 : index
    %c0_19 = arith.constant 0 : index
    %34 = vector.load %arg7[%c0_18, %c0_19] : memref<8x1xf32, #tpu.memory_space<vmem>>, vector<8x1xf32>
    tpu.vector_store %arg7[%c0_18, %c0_19], %33 {strides = array<i32>} : memref<8x1xf32, #tpu.memory_space<vmem>>, vector<8x1xf32>,
    %c0_20 = arith.constant 0 : index
    %c0_21 = arith.constant 0 : index
    %35 = vector.load %arg8[%c0_20, %c0_21] : memref<8x1xf32, #tpu.memory_space<vmem>>, vector<8x1xf32>
    %36 = arith.mulf %22, %35 : vector<8x1xf32>
    %cst_22 = arith.constant dense<0.000000e+00> : vector<8xf32>
    %37 = vector.multi_reduction <add>, %28, %cst_22 [1] : vector<8x128xf32> to vector<8xf32>
    %38 = vector.shape_cast %37 : vector<8xf32> to vector<8x1xf32>
    %39 = arith.addf %36, %38 : vector<8x1xf32>
    %c0_23 = arith.constant 0 : index
    %c0_24 = arith.constant 0 : index
    %40 = vector.load %arg8[%c0_23, %c0_24] : memref<8x1xf32, #tpu.memory_space<vmem>>, vector<8x1xf32>
    tpu.vector_store %arg8[%c0_23, %c0_24], %39 {strides = array<i32>} : memref<8x1xf32, #tpu.memory_space<vmem>>, vector<8x1xf32>,
    %41 = arith.mulf %28, %5 : vector<8x128xf32>
    %c0_25 = arith.constant 0 : index
    %c0_26 = arith.constant 0 : index
    %42 = vector.load %arg9[%c0_25, %c0_26] : memref<8x1xf32, #tpu.memory_space<vmem>>, vector<8x1xf32>
    %43 = arith.mulf %22, %42 : vector<8x1xf32>
    %cst_27 = arith.constant dense<0.000000e+00> : vector<8xf32>
    %44 = vector.multi_reduction <add>, %41, %cst_27 [1] : vector<8x128xf32> to vector<8xf32>
    %45 = vector.shape_cast %44 : vector<8xf32> to vector<8x1xf32>
    %46 = arith.addf %43, %45 : vector<8x1xf32>
    %c0_28 = arith.constant 0 : index
    %c0_29 = arith.constant 0 : index
    %47 = vector.load %arg9[%c0_28, %c0_29] : memref<8x1xf32, #tpu.memory_space<vmem>>, vector<8x1xf32>
    tpu.vector_store %arg9[%c0_28, %c0_29], %46 {strides = array<i32>} : memref<8x1xf32, #tpu.memory_space<vmem>>, vector<8x1xf32>,
    %c0_30 = arith.constant 0 : index
    %c0_31 = arith.constant 0 : index
    %48 = vector.load %arg5[%c0_30, %c0_31] : memref<8x1xf32, #tpu.memory_space<vmem>>, vector<8x1xf32>
    tpu.vector_store %arg5[%c0_30, %c0_31], %12 {strides = array<i32>} : memref<8x1xf32, #tpu.memory_space<vmem>>, vector<8x1xf32>,
    %c0_32 = arith.constant 0 : index
    %c0_33 = arith.constant 0 : index
    %49 = vector.load %arg6[%c0_32, %c0_33] : memref<8x1xf32, #tpu.memory_space<vmem>>, vector<8x1xf32>
    tpu.vector_store %arg6[%c0_32, %c0_33], %16 {strides = array<i32>} : memref<8x1xf32, #tpu.memory_space<vmem>>, vector<8x1xf32>,
    %c0_i32_34 = arith.constant 0 : i32
    %50 = arith.cmpi eq, %arg1, %c0_i32_34 : i32
    %51 = arith.extui %50 : i1 to i32
    %c0_i32_35 = arith.constant 0 : i32
    %52 = arith.cmpi ne, %51, %c0_i32_35 : i32
    scf.if %52 {
      %c0_36 = arith.constant 0 : index
      %c0_37 = arith.constant 0 : index
      %53 = vector.load %arg8[%c0_36, %c0_37] : memref<8x1xf32, #tpu.memory_space<vmem>>, vector<8x1xf32>
      %54 = tpu.reciprocal %53 : vector<8x1xf32> -> vector<8x1xf32>
      %c0_38 = arith.constant 0 : index
      %c0_39 = arith.constant 0 : index
      %55 = vector.load %arg7[%c0_38, %c0_39] : memref<8x1xf32, #tpu.memory_space<vmem>>, vector<8x1xf32>
      %56 = math.log %55 : vector<8x1xf32>
      %c0_40 = arith.constant 0 : index
      %c0_41 = arith.constant 0 : index
      %57 = vector.load %arg5[%c0_40, %c0_41] : memref<8x1xf32, #tpu.memory_space<vmem>>, vector<8x1xf32>
      %58 = arith.addf %57, %56 : vector<8x1xf32>
      %c0_42 = arith.constant 0 : index
      %c0_43 = arith.constant 0 : index
      %59 = vector.load %arg9[%c0_42, %c0_43] : memref<8x1xf32, #tpu.memory_space<vmem>>, vector<8x1xf32>
      %60 = arith.mulf %59, %54 : vector<8x1xf32>
      %61 = arith.subf %58, %60 : vector<8x1xf32>
      %c0_44 = arith.constant 0 : index
      %c0_45 = arith.constant 0 : index
      %62 = vector.load %arg4[%c0_44, %c0_45] : memref<8x1xf32, #tpu.memory_space<vmem>>, vector<8x1xf32>
      tpu.vector_store %arg4[%c0_44, %c0_45], %61 {strides = array<i32>} : memref<8x1xf32, #tpu.memory_space<vmem>>, vector<8x1xf32>,
    } else {
    }
    return
  }
  func.func @transform_0(%arg0: i32, %arg1: i32) -> (i32, i32) {
    %c0_i32 = arith.constant 0 : i32
    return %arg0, %arg1 : i32, i32
  }
  func.func @transform_1(%arg0: i32, %arg1: i32) -> (i32, i32) {
    %c0_i32 = arith.constant 0 : i32
    return %arg0, %arg1 : i32, i32
  }
  func.func @transform_2(%arg0: i32, %arg1: i32) -> (i32, i32) {
    %c0_i32 = arith.constant 0 : i32
    %c0_i32_0 = arith.constant 0 : i32
    return %arg0, %c0_i32 : i32, i32
  }
}

</mosaic_0001>

<bundles_post_ra>
// kernel: tpu_custom_call.1
= control target key start
LH: loop header
LB: loop body
LE: loop exit
PB: predicated region body
PF: predicated region fallthrough
CT: control target
= control target key end

     0   :  { %7 = vsyncpa [#allocation8], 0  ;;  %s802_s0 = inlined_call_operand.hbm [shape: f32[16,128], index: 0, kind: input, shape index: {}]   ;;  %s803_s1 = inlined_call_operand.hbm [shape: f32[16,128], index: 1, kind: input, shape index: {}]   ;;  %s804_s2 = inlined_call_operand.vmem [shape: f32[16,1], index: 2, kind: output, shape index: {}]  }
   0x1   :  { %9 = vsyncpa [#allocation8 + $0x1], 0 }
   0x2   :  { %10 = vsyncpa [#allocation10], 0 }
   0x3   :  { %12 = vsyncpa [#allocation10 + $0x1], 0  ;;  %s619_s9 = smov 0   ;;  %s621_s10 = smov 0  }
   0x4   :  { %s623_s11 = smov 0   ;;  %s625_s12 = smov 0  }
   0x5   :  { %s627_s13 = smov 0   ;;  %s629_s14 = smov 0  }
   0x6 LB: > { %s392_s15 = sadd.s32 4294967295, %s597_s14   ;;  %s30_s16 = sadd.s32 1, %s593_s13  ;;  %s597_s14 = sphi %s629_s14, %s18_s14   ;;  %s593_s13 = sphi %s627_s13, %s818_s13   ;;  %s589_s12 = sphi %s625_s12, %s817_s12   ;;  %s585_s11 = sphi %s623_s11, %s816_s11   ;;  %s581_s10 = sphi %s621_s10, %s815_s10   ;;  %s577_s9 = sphi %s619_s9, %s814_s9  }
   0x7   : > { %p32_p0 = scmp.ge.s32.totalorder %s30_s16, 2  ;;  %s39_s17 = sadd.s32 1, %s585_s11 }
   0x8   : > { %p46_p1 = scmp.ne.s32.totalorder %s585_s11, %s581_s10  ;;  %p47_p2 = scmp.eq.s32.totalorder %s597_s14, 0 }
   0x9   : > { %s820_s16 = smov (%p32_p0, %s30_s16), 0  ;;  %p52_p4 = scmp.ne.s32.totalorder %s581_s10, %s577_s9 }
   0xa   : > { %p655_p3 = por %p47_p2, %p46_p1  ;;  %s34_s19 = ssub.s32 %s593_s13, %s820_s16 }
   0xb   : > { %p53_p5 = scmp.eq.s32.totalorder %s392_s15, 0  ;;  %p37_p6 = scmp.eq.s32.totalorder %s34_s19, 0 }
   0xc   : > { %p417_p8 = scmp.lt.s32.totalorder %s597_s14, 2  ;;  %s671_s22 = sand.u32 1, %s585_s11  }
   0xd   : > { %p662_p7 = por %p53_p5, %p52_p4  ;;  %s397_s23 = sshll.u32 %s593_s13, 7 }
   0xe   : > { %s668_s21 = scalar_select %p37_p6, %s585_s11, %s39_s17  }
   0xf   : > { %s807_s20 = scalar_select %p662_p7, 1, 0 }
  0x10   : > { %s396_s24 = sshll.u32 %s671_s22, 3  ;;  %s680_s27 = scalar_lea.hbm %s802_s0, %s397_s23 }
  0x11   : > { %s134_s28 = scalar_lea.vmem [#allocation7], %s396_s24  ;;  %p686_p9 = pnand %p417_p8, %p655_p3 }
  0x12   : > { %s142_s29 = sshll.u32 %s134_s28, 4  ;;  %s131_s3 = scalar_lea.sflag [#allocation8], %s671_s22  ;;  %s690_s29 = int_to_ptr.vmem [resolvable:$true] %s142_s29 }
  0x13   : > { %s483_s4 = scalar_lea.hbm %s680_s27, 128  ;;  %p485_p13 = pneg %p686_p9 }
  0x14   : > { %p484_p12 = scmp.ne.s32.totalorder %s680_s27, %s483_s4  ;;  %s488_s7 = scalar_lea.hbm %s802_s0, 256 }
  0x15   : > { %p489_p2 = scmp.lt.u32.totalorder %s680_s27, %s802_s0  ;;  %p490_p3 = scmp.lt.u32.totalorder %s488_s7, %s483_s4 }
  0x16   : > { %p486_p0 = pnand %p485_p13, %p484_p12  ;;  %p492_p5 = scmp.lt.u32.totalorder %s483_s4, %s680_s27 }
  0x17   : > { %p491_p4 = por %p490_p3, %p489_p2 }
  0x18   : > { %p487_p1 = pneg %p486_p0 }
  0x19   : > { %p493_p6 = por %p492_p5, %p491_p4 }
  0x1b   : > { %p494_p8 = pnand %p493_p6, %p487_p1 }
  0x1d   : > { %497 = shalt.err (!%p494_p8)
}
  0x1e   : > { %s498_s15 = scalar_lea.vmem %s690_s29, 128  ;;  %s599_s17 = smov [#allocation7]  }
  0x1f   : > { %p499_p12 = scmp.ne.s32.totalorder %s690_s29, %s498_s15  ;;  %s503_s18 = sshll.u32 %s599_s17, 4  ;;  %s504_s18 = int_to_ptr.vmem [resolvable:$false] %s503_s18 }
  0x20   : > { %s505_s19 = scalar_lea.vmem %s504_s18, 256  ;;  %p506_p11 = scmp.lt.s32.totalorder %s690_s29, %s504_s18 }
  0x21   : > { %p501_p0 = pnand %p499_p12, %p485_p13  ;;  %p507_p2 = scmp.lt.s32.totalorder %s505_s19, %s498_s15 }
  0x23   : > { %p502_p10 = pneg %p501_p0  ;;  %p508_p3 = por %p507_p2, %p506_p11 }
  0x25   : > { %p509_p4 = pnand %p508_p3, %p502_p10 }
  0x27   : > { %512 = shalt.err (!%p509_p4)
}
  0x28   : > { %413 = dma.hbm_to_vmem [thread:$0]  (!%p686_p9), %s680_s27, 128, %s690_s29, %s131_s3  }
  0x29   : > { %p809_p1 = scmp.lt.s32.totalorder %s597_s14, 3  ;;  %p810_p5 = scmp.ge.s32.totalorder %s597_s14, 1 }
  0x2a   : > { %s733_s4 = scalar_lea.hbm %s803_s1, %s397_s23  ;;  %s153_s5 = scalar_lea.vmem [#allocation9], %s396_s24 }
  0x2b   : > { %p724_p6 = pnand %p810_p5, %p809_p1  ;;  %s161_s6 = sshll.u32 %s153_s5, 4  ;;  %s162_s6 = int_to_ptr.vmem [resolvable:$true] %s161_s6 }
  0x2c   : > { %s150_s27 = scalar_lea.sflag [#allocation10], %s671_s22  ;;  %s513_s29 = scalar_lea.hbm %s733_s4, 128 }
  0x2d   : > { %s811_s25 = scalar_select %p724_p6, 1, 0 }
  0x2e   : > { %p514_p10 = scmp.ne.s32.totalorder %s733_s4, %s513_s29  ;;  %s518_s23 = scalar_lea.hbm %s803_s1, 256 }
  0x2f   : > { %p519_p12 = scmp.lt.u32.totalorder %s733_s4, %s803_s1  ;;  %p520_p0 = scmp.lt.u32.totalorder %s518_s23, %s513_s29 }
  0x30   : > { %p516_p11 = pnand %p514_p10, %p485_p13  ;;  %p522_p3 = scmp.lt.u32.totalorder %s513_s29, %s733_s4 }
  0x31   : > { %p521_p2 = por %p520_p0, %p519_p12 }
  0x32   : > { %p517_p8 = pneg %p516_p11 }
  0x33   : > { %p523_p4 = por %p522_p3, %p521_p2 }
  0x35   : > { %p524_p1 = pnand %p523_p4, %p517_p8 }
  0x37   : > { %527 = shalt.err (!%p524_p1)
}
  0x38   : > { %s528_s22 = scalar_lea.vmem %s162_s6, 128  ;;  %s600_s24 = smov [#allocation9]  }
  0x39   : > { %p529_p5 = scmp.ne.s32.totalorder %s162_s6, %s528_s22  ;;  %s533_s15 = sshll.u32 %s600_s24, 4  ;;  %s534_s15 = int_to_ptr.vmem [resolvable:$false] %s533_s15 }
  0x3a   : > { %s535_s17 = scalar_lea.vmem %s534_s15, 256  ;;  %p536_p7 = scmp.lt.s32.totalorder %s162_s6, %s534_s15 }
  0x3b   : > { %p531_p10 = pnand %p529_p5, %p485_p13  ;;  %p537_p6 = scmp.lt.s32.totalorder %s535_s17, %s528_s22 }
  0x3d   : > { %p532_p11 = pneg %p531_p10  ;;  %p538_p0 = por %p537_p6, %p536_p7 }
  0x3f   : > { %p539_p12 = pnand %p538_p0, %p532_p11 }
  0x41   : > { %542 = shalt.err (!%p539_p12)
}
  0x42   : > { %416 = dma.hbm_to_vmem [thread:$0]  (!%p686_p9), %s733_s4, 128, %s162_s6, %s150_s27  }
  0x43   : > { %p812_p8 = scmp.ne.s32.totalorder %s811_s25, 0 }
  0x44   : > { %s172_s18 = sand.u32 (!%p812_p8), 1, %s581_s10   ;;  %p813_p13 = scmp.ne.s32.totalorder (!%p812_p8), %s807_s20, 0 }
  0x45   : > { %170 = sbr.rel (%p812_p8) target bundleno = 541 (0x21d), region = 28  ;;  %s401_s19 = sshll.u32 (!%p812_p8), %s172_s18, 3 }
  0x46   : > { %s173_s26 = scalar_lea.sflag (!%p812_p8), [#allocation8], %s172_s18  ;;  %s176_s28 = scalar_lea.vmem (!%p812_p8), [#allocation7], %s401_s19 }
  0x4c   : > { %568 = dma.done.wait (%p813_p13), %s173_s26, 128  }
  0x4d   : > { %570 = vsyncadd (%p813_p13), %s173_s26, 4294967168  ;;  %s182_s5 = scalar_lea.sflag [#allocation10], %s172_s18  ;;  %s185_s29 = scalar_lea.vmem [#allocation9], %s401_s19 }
  0x4e   : > { %572 = dma.done.wait (%p813_p13), %s182_s5, 128  }
  0x4f   : > { %574 = vsyncadd (%p813_p13), %s182_s5, 4294967168  ;;  %vm218_vm0 = vcmask 7168   ;;  %v601_v0 = vmov -1e+30   ;;  %v224_v1 = vld [vmem:[%s176_s28] sm:$0xff]  ;;  %v226_v2 = vld [vmem:[%s185_s29] sm:$0xff] }
  0x50   : > { %219 = vst.msk [vmem:[#allocation2] sm:$0xff] %vm218_vm0, %v601_v0  ;;  %220 = vst.msk [vmem:[#allocation3] sm:$0xff] %vm218_vm0, %v601_v0  ;;  %v225_v3 = vmul.f32 0.25, %v224_v1  ;;  %v227_v4 = vmul.f32 0.25, %v226_v2  ;;  %v602_v5 = vmov 0   ;;  %v603_v6 = vmov 0.0  }
  0x51   : > { %469 = vset.pattern.permute.xlu1 %v602_v5  ;;  %470 = vset.pattern.permute.xlu0 %v602_v5  ;;  %221 = vst.msk [vmem:[#allocation4] sm:$0xff] %vm218_vm0, %v603_v6  ;;  %222 = vst.msk [vmem:[#allocation5] sm:$0xff] %vm218_vm0, %v603_v6  ;;  %p210_p7 = scmp.lt.s32.totalorder %s589_s12, 1 }
  0x52   : > { %229 = vmax.xlane.f32.xlu0 %v225_v3  ;;  %223 = vst.msk [vmem:[#allocation6] sm:$0xff] %vm218_vm0, %v603_v6 }
  0x53   : > { %s822_s12 = smov (!%p210_p7, %s589_s12), 1 }
  0x54   : > { %s403_s20 = sshll.u32 %s822_s12, 3 }
  0x55   : > { %s213_s4 = scalar_lea.vmem %s804_s2, %s403_s20 }
  0x56   : > { %233 = vmax.xlane.f32.xlu0 %v227_v4 }
  0x57   : > { %v228_v7 = vld [vmem:[#allocation2] sm:$0xff]  ;;  %v232_v10 = vld [vmem:[#allocation3] sm:$0xff] }
  0x58   : > { %v258_v27 = vld [vmem:[#allocation4] sm:$0xff]  ;;  %v265_v31 = vld [vmem:[#allocation5] sm:$0xff] }
  0x59   : > { %v272_v33 = vld [vmem:[#allocation6] sm:$0xff] }
  0xdf   : > { %v230_v8 = vpop.xlane.xlu0 %229 }
  0xe0   : > { %v231_v9 = vmax.f32 %v228_v7, %v230_v8 }
  0xe2   : > { %v236_v11 = vsub.f32 %v228_v7, %v231_v9  ;;  %278 = vst.msk [vmem:[#allocation2] sm:$0xff] %vm218_vm0, %v231_v9  ;;  %244 = vperm.xlu1 %469, %v231_v9  }
  0xe3   : > { %v234_v12 = vpop.xlane.xlu0 %233 }
  0xe4   : > { %v235_v13 = vmax.f32 %v232_v10, %v234_v12  ;;  %v237_v24 = vmul.f32 1.442695, %v236_v11 }
  0xe6   : > { %v239_v14 = vsub.f32 %v232_v10, %v235_v13  ;;  %279 = vst.msk [vmem:[#allocation3] sm:$0xff] %vm218_vm0, %v235_v13  ;;  %252 = vperm.xlu1 %469, %v235_v13  }
  0xe8   : > { %v240_v25 = vmul.f32 1.442695, %v239_v14 }
  0xe9   : > { %v288_v45 = vld [vmem:[#allocation2] sm:$0xff] }
 0x161   : > { %v245_v15 = vpop.permute.xlu1 %244 }
 0x162   : > { %v247_v16 = vsub.f32 %v225_v3, %v245_v15 }
 0x164   : > { %v248_v17 = vmul.f32 1.442695, %v247_v16 }
 0x165   : > { %v253_v18 = vpop.permute.xlu1 %252 }
 0x166   : > { %471 = vpow2.f32 %v248_v17  ;;  %v255_v19 = vsub.f32 %v227_v4, %v253_v18 }
 0x168   : > { %v256_v20 = vmul.f32 1.442695, %v255_v19 }
 0x16a   : > { %473 = vpow2.f32 %v256_v20 }
 0x16b   : > { %475 = vpow2.f32 %v237_v24 }
 0x16c   : > { %477 = vpow2.f32 %v240_v25 }
 0x170   : > { %v472_v21 = vpop.eup %471 }
 0x171   : > { %260 = vadd.xlane.f32.xlu0 %v472_v21 }
 0x174   : > { %v474_v22 = vpop.eup %473 }
 0x175   : > { %267 = vadd.xlane.f32.xlu1 %v474_v22  ;;  %v271_v23 = vmul.f32 %v474_v22, %v225_v3  ;;  %v476_v26 = vpop.eup %475 }
 0x176   : > { %v259_v28 = vmul.f32 %v476_v26, %v258_v27  ;;  %v478_v29 = vpop.eup %477 }
 0x177   : > { %274 = vadd.xlane.f32.xlu0 %v271_v23  ;;  %v266_v34 = vmul.f32 %v478_v29, %v265_v31  ;;  %v273_v37 = vmul.f32 %v478_v29, %v272_v33 }
 0x1fe   : > { %v261_v30 = vpop.xlane.xlu0 %260 }
 0x1ff   : > { %v262_v32 = vadd.f32 %v261_v30, %v259_v28 }
 0x201   : > { %264 = vst.msk [vmem:[#allocation4] sm:$0xff] %vm218_vm0, %v262_v32 }
 0x202   : > { %v268_v35 = vpop.xlane.xlu1 %267 }
 0x203   : > { %v269_v36 = vadd.f32 %v268_v35, %v266_v34 }
 0x204   : > { %v275_v38 = vpop.xlane.xlu0 %274 }
 0x205   : > { %270 = vst.msk [vmem:[#allocation5] sm:$0xff] %vm218_vm0, %v269_v36  ;;  %v276_v39 = vadd.f32 %v275_v38, %v273_v37 }
 0x207   : > { %277 = vst.msk [vmem:[#allocation6] sm:$0xff] %vm218_vm0, %v276_v39 }
 0x208   : > { %v285_v40 = vld [vmem:[#allocation4] sm:$0xff] }
 0x209   : > { %479 = vlog2.f32 %v285_v40 }
 0x20c   : > { %v283_v41 = vld [vmem:[#allocation5] sm:$0xff] }
 0x20d   : > { %481 = vrcp.f32 %v283_v41 }
 0x20e   : > { %v290_v46 = vld [vmem:[#allocation6] sm:$0xff] }
 0x213   : > { %v480_v42 = vpop.eup %479 }
 0x214   : > { %v287_v43 = vmul.f32 0.6931472, %v480_v42 }
 0x216   : > { %v289_v47 = vadd.f32 %v288_v45, %v287_v43 }
 0x217   : > { %v482_v44 = vpop.eup %481 }
 0x218   : > { %v291_v48 = vmul.f32 %v482_v44, %v290_v46 }
 0x21a   : > { %v292_v49 = vsub.f32 %v289_v47, %v291_v48 }
 0x21c   : > { %293 = vst.msk [vmem:[%s213_s4] sm:$0xff] %vm218_vm0, %v292_v49 }
 0x21d PF: > { %s18_s14 = sadd.s32 1, %s597_s14   ;;  %s814_s9 = smov %s581_s10 }
 0x21e   : > { %p15_p9 = scmp.ge.s32.totalorder %s18_s14, 4   ;;  %s815_s10 = smov %s585_s11 }
 0x21f   : > { %s816_s11 = smov %s668_s21  ;;  %s817_s12 = smov %s593_s13 }
 0x220   : > { %s818_s13 = smov %s820_s16  ;;  %17 = sbr.rel (!%p15_p9) target bundleno = 6 (0x6), region = 89 }
 0x227   :  { %313 = vsyncpa [#allocation8], 1 }
 0x228   :  { %315 = vsyncpa [#allocation8 + $0x1], 1 }
 0x229   :  { %316 = vsyncpa [#allocation10], 1 }
 0x22a   :  { %318 = vsyncpa [#allocation10 + $0x1], 1 }

</bundles_post_ra>
